<compile_context>
chip_gen: v6e
topology: v6e:2x2x1
jax: 0.10.0
libtpu: 0.0.40
codegen_flags: <defaults>
</compile_context>

<pallas_src>
import jax
import jax.numpy as jnp
from jax import lax
from jax.experimental import pallas as pl
from jax.experimental.pallas import tpu as pltpu

EPS = 1e-5


# ----------------------------- Pallas kernel -----------------------------
def basic_deconv_block_kernel(x_ref, w_ref, b_ref, o_ref):
    nb, C, L = x_ref.shape

    w1 = w_ref[0]                                   # (C, 3C)
    w2 = w_ref[1]
    b1 = b_ref[0]                                   # (C, 1)
    b2 = b_ref[1]

    # Edge masks for the zero-padded k=3 convolution (hoisted out of the loop).
    col = lax.broadcasted_iota(jnp.int32, (C, L), 1)
    left_edge = col == 0
    right_edge = col == (L - 1)

    def tap_stack(h):
        # h[l-1] and h[l+1] via lane rotation (XLU) + zero-padding at edges.
        h_prev = jnp.where(left_edge, 0.0, pltpu.roll(h, 1, axis=1))
        h_next = jnp.where(right_edge, 0.0, pltpu.roll(h, L - 1, axis=1))
        return jnp.concatenate([h_prev, h, h_next], axis=0)      # (3C, L)

    # Static unrolled loop over the NB samples in this block (NB is small;
    # the whole block's DMA is already large enough to keep HBM busy).
    for i in range(nb):
        x = x_ref[i]                                # (C, L), L on lanes

        # conv1 (+ folded BN1) + ReLU  -- one MXU matmul, contraction 3C.
        h = jnp.dot(w1, tap_stack(x), preferred_element_type=jnp.float32)
        h = jnp.maximum(h + b1, 0.0)

        # conv2 (+ folded BN2) + residual + ReLU.
        y = jnp.dot(w2, tap_stack(h), preferred_element_type=jnp.float32)
        y = y + b2 + x
        o_ref[i] = jnp.maximum(y, 0.0).astype(o_ref.dtype)


# ----------------------------- wrapper -----------------------------
def _fold_bn_into_conv(w_pt, bn):
    """w_pt: (Cout, Cin, 3) PyTorch layout.  bn = (gamma, beta, mean, var)."""
    gamma, beta, mean, var = bn
    s = gamma * lax.rsqrt(var + EPS)                    # (Cout,)
    wf = w_pt * s[:, None, None]                        # scale per out-channel
    bias = beta - mean * s                              # (Cout,)
    # (Cout, Cin, 3) -> (Cout, 3*Cin), ordered [tap l-1 | tap l | tap l+1]
    w_fused = jnp.concatenate([wf[:, :, 0], wf[:, :, 1], wf[:, :, 2]], axis=1)
    return w_fused, bias


def basic_deconv_block(x_ncl, w1_pt, w2_pt, bn1, bn2, *, max_nb=8):
    """x_ncl: (N, C, L) float32.  w*_pt: (Cout, Cin, 3) PyTorch-layout weights.
    bn* = (gamma, beta, running_mean, running_var), each (C,)."""
    N, C, L = x_ncl.shape
    assert w1_pt.shape == (C, C, 3) and w2_pt.shape == (C, C, 3), \
        "stride=1 / upsample=None path requires inplanes == planes"

    # Samples per grid step: largest divisor of N not exceeding max_nb, so
    # every block is full (no out-of-bounds tiles) and DMAs stay large.
    nb = min(N, max_nb)
    while N % nb:
        nb -= 1

    w1f, b1 = _fold_bn_into_conv(w1_pt, bn1)
    w2f, b2 = _fold_bn_into_conv(w2_pt, bn2)
    wpack = jnp.stack([w1f, w2f], axis=0)               # (2, C, 3C)
    bpack = jnp.stack([b1, b2], axis=0).reshape(2, C, 1)

    return pl.pallas_call(
        basic_deconv_block_kernel,
        out_shape=jax.ShapeDtypeStruct((N, C, L), x_ncl.dtype),
        grid=(N // nb,),
        in_specs=[
            pl.BlockSpec((nb, C, L), lambda n: (n, 0, 0)),       # x slab
            pl.BlockSpec((2, C, 3 * C), lambda n: (0, 0, 0)),    # folded weights
            pl.BlockSpec((2, C, 1), lambda n: (0, 0, 0)),        # folded biases
        ],
        out_specs=pl.BlockSpec((nb, C, L), lambda n: (n, 0, 0)),
        compiler_params=pltpu.CompilerParams(
            dimension_semantics=("parallel",)),
    )(x_ncl, wpack, bpack)


# ----------------------------- reference (pure JAX) -----------------------------
def _ref_conv1d(x_ncl, w_pt):
    return lax.conv_general_dilated(
        x_ncl, w_pt, window_strides=(1,), padding=[(1, 1)],
        dimension_numbers=("NCH", "OIH", "NCH"))


def _ref_bn(x_ncl, g, b, m, v):
    g = g[None, :, None]; b = b[None, :, None]
    m = m[None, :, None]; v = v[None, :, None]
    return (x_ncl - m) * (g * lax.rsqrt(v + EPS)) + b


def reference_block(x_ncl, w1_pt, w2_pt, bn1, bn2):
    out = _ref_conv1d(x_ncl, w1_pt)
    out = jnp.maximum(_ref_bn(out, *bn1), 0.0)
    out = _ref_conv1d(out, w2_pt)
    out = _ref_bn(out, *bn2)
    return jnp.maximum(out + x_ncl, 0.0)


if __name__ == "__main__":
    # inplanes == planes == 8, stride=1, upsample=None; L multiple of 128 so
    # the sequence axis is lane-dense.
    N, C, L = 4, 8, 256
    key = jax.random.PRNGKey(0)
    ks = jax.random.split(key, 8)

    x = jax.random.normal(ks[0], (N, C, L), dtype=jnp.float32)
    w_scale = 1.0 / jnp.sqrt(3.0 * C)
    w1_pt = w_scale * jax.random.normal(ks[1], (C, C, 3), dtype=jnp.float32)
    w2_pt = w_scale * jax.random.normal(ks[2], (C, C, 3), dtype=jnp.float32)

    def make_bn(k):
        kg, kb, km, kv = jax.random.split(k, 4)
        gamma = 1.0 + 0.1 * jax.random.normal(kg, (C,), dtype=jnp.float32)
        beta = 0.1 * jax.random.normal(kb, (C,), dtype=jnp.float32)
        mean = 0.05 * jax.random.normal(km, (C,), dtype=jnp.float32)
        var = 0.5 + jnp.abs(jax.random.normal(kv, (C,), dtype=jnp.float32)) * 0.5
        return (gamma, beta, mean, var)

    bn1 = make_bn(ks[3])
    bn2 = make_bn(ks[4])

    out = basic_deconv_block(x, w1_pt, w2_pt, bn1, bn2)
    out = jax.block_until_ready(out)

    ref = reference_block(x, w1_pt, w2_pt, bn1, bn2)
    assert out.shape == (N, C, L)
    err = float(jnp.max(jnp.abs(out - ref)))
    assert jnp.allclose(out, ref, atol=2e-4, rtol=2e-4), err

    print("KERNEL_OK")
</pallas_src>

<mosaic_0001>
module attributes {stable_mosaic.version = 11 : i64} {
  func.func @basic_deconv_block_kernel(%arg0: i32, %arg1: memref<4x8x256xf32, #tpu.memory_space<vmem>>, %arg2: memref<2x8x24xf32, #tpu.memory_space<vmem>>, %arg3: memref<2x8x1xf32, #tpu.memory_space<vmem>>, %arg4: memref<4x8x256xf32, #tpu.memory_space<vmem>>) attributes {dimension_semantics = [#tpu.dimension_semantics<parallel>], iteration_bounds = array<i64: 1>, scalar_prefetch = 0 : i64, scratch_operands = 0 : i64, tpu.core_type = #tpu.core_type<tc>, window_params = [{transform_indices = @transform_0, window_bounds = array<i64: 4, 8, 256>}, {pipeline_mode = #tpu.pipeline_mode<synchronous>, transform_indices = @transform_1, window_bounds = array<i64: 2, 8, 24>}, {pipeline_mode = #tpu.pipeline_mode<synchronous>, transform_indices = @transform_2, window_bounds = array<i64: 2, 8, 1>}, {transform_indices = @transform_3, window_bounds = array<i64: 4, 8, 256>}]} {
    %c0 = arith.constant 0 : index
    %c0_0 = arith.constant 0 : index
    %c0_1 = arith.constant 0 : index
    %0 = vector.load %arg2[%c0, %c0_0, %c0_1] : memref<2x8x24xf32, #tpu.memory_space<vmem>>, vector<1x8x24xf32>
    %1 = vector.shape_cast %0 : vector<1x8x24xf32> to vector<8x24xf32>
    %c1 = arith.constant 1 : index
    %c0_2 = arith.constant 0 : index
    %c0_3 = arith.constant 0 : index
    %2 = vector.load %arg2[%c1, %c0_2, %c0_3] : memref<2x8x24xf32, #tpu.memory_space<vmem>>, vector<1x8x24xf32>
    %3 = vector.shape_cast %2 : vector<1x8x24xf32> to vector<8x24xf32>
    %c0_4 = arith.constant 0 : index
    %c0_5 = arith.constant 0 : index
    %c0_6 = arith.constant 0 : index
    %4 = vector.load %arg3[%c0_4, %c0_5, %c0_6] : memref<2x8x1xf32, #tpu.memory_space<vmem>>, vector<1x8x1xf32>
    %5 = vector.shape_cast %4 : vector<1x8x1xf32> to vector<8x1xf32>
    %c1_7 = arith.constant 1 : index
    %c0_8 = arith.constant 0 : index
    %c0_9 = arith.constant 0 : index
    %6 = vector.load %arg3[%c1_7, %c0_8, %c0_9] : memref<2x8x1xf32, #tpu.memory_space<vmem>>, vector<1x8x1xf32>
    %7 = vector.shape_cast %6 : vector<1x8x1xf32> to vector<8x1xf32>
    %8 = tpu.iota {dimensions = array<i32: 1>} : vector<8x256xi32>
    %c0_i32 = arith.constant 0 : i32
    %9 = vector.broadcast %c0_i32 : i32 to vector<8x256xi32>
    %10 = arith.cmpi eq, %8, %9 : vector<8x256xi32>
    %c255_i32 = arith.constant 255 : i32
    %11 = vector.broadcast %c255_i32 : i32 to vector<8x256xi32>
    %12 = arith.cmpi eq, %8, %11 : vector<8x256xi32>
    %c0_10 = arith.constant 0 : index
    %c0_11 = arith.constant 0 : index
    %c0_12 = arith.constant 0 : index
    %13 = vector.load %arg1[%c0_10, %c0_11, %c0_12] : memref<4x8x256xf32, #tpu.memory_space<vmem>>, vector<1x8x256xf32>
    %14 = vector.shape_cast %13 : vector<1x8x256xf32> to vector<8x256xf32>
    %c1_i32 = arith.constant 1 : i32
    %15 = tpu.dynamic_rotate %14 by %c1_i32 dim 1 : vector<8x256xf32>, i32 -> vector<8x256xf32>
    %cst = arith.constant 0.000000e+00 : f32
    %16 = vector.broadcast %cst : f32 to vector<8x256xf32>
    %17 = arith.select %10, %16, %15 : vector<8x256xi1>, vector<8x256xf32>
    %c255_i32_13 = arith.constant 255 : i32
    %18 = tpu.dynamic_rotate %14 by %c255_i32_13 dim 1 : vector<8x256xf32>, i32 -> vector<8x256xf32>
    %cst_14 = arith.constant 0.000000e+00 : f32
    %19 = vector.broadcast %cst_14 : f32 to vector<8x256xf32>
    %20 = arith.select %12, %19, %18 : vector<8x256xi1>, vector<8x256xf32>
    %21 = tpu.concatenate %17, %14, %20 in 0 : vector<8x256xf32>, vector<8x256xf32>, vector<8x256xf32> -> vector<24x256xf32>
    %cst_15 = arith.constant dense<0.000000e+00> : vector<8x256xf32>
    %22 = tpu.matmul %1, %21, %cst_15 {dimension_numbers = #tpu.dot_dimension_numbers<[1], [0], [0], [1], [0, 0, 1, 1], [], []>} : vector<8x24xf32>, vector<24x256xf32>, vector<8x256xf32> -> vector<8x256xf32>
    %23 = vector.broadcast %5 : vector<8x1xf32> to vector<8x256xf32>
    %24 = arith.addf %22, %23 : vector<8x256xf32>
    %cst_16 = arith.constant 0.000000e+00 : f32
    %25 = vector.broadcast %cst_16 : f32 to vector<8x256xf32>
    %26 = arith.maximumf %24, %25 : vector<8x256xf32>
    %c1_i32_17 = arith.constant 1 : i32
    %27 = tpu.dynamic_rotate %26 by %c1_i32_17 dim 1 : vector<8x256xf32>, i32 -> vector<8x256xf32>
    %cst_18 = arith.constant 0.000000e+00 : f32
    %28 = vector.broadcast %cst_18 : f32 to vector<8x256xf32>
    %29 = arith.select %10, %28, %27 : vector<8x256xi1>, vector<8x256xf32>
    %c255_i32_19 = arith.constant 255 : i32
    %30 = tpu.dynamic_rotate %26 by %c255_i32_19 dim 1 : vector<8x256xf32>, i32 -> vector<8x256xf32>
    %cst_20 = arith.constant 0.000000e+00 : f32
    %31 = vector.broadcast %cst_20 : f32 to vector<8x256xf32>
    %32 = arith.select %12, %31, %30 : vector<8x256xi1>, vector<8x256xf32>
    %33 = tpu.concatenate %29, %26, %32 in 0 : vector<8x256xf32>, vector<8x256xf32>, vector<8x256xf32> -> vector<24x256xf32>
    %cst_21 = arith.constant dense<0.000000e+00> : vector<8x256xf32>
    %34 = tpu.matmul %3, %33, %cst_21 {dimension_numbers = #tpu.dot_dimension_numbers<[1], [0], [0], [1], [0, 0, 1, 1], [], []>} : vector<8x24xf32>, vector<24x256xf32>, vector<8x256xf32> -> vector<8x256xf32>
    %35 = vector.broadcast %7 : vector<8x1xf32> to vector<8x256xf32>
    %36 = arith.addf %34, %35 : vector<8x256xf32>
    %37 = arith.addf %36, %14 : vector<8x256xf32>
    %cst_22 = arith.constant 0.000000e+00 : f32
    %38 = vector.broadcast %cst_22 : f32 to vector<8x256xf32>
    %39 = arith.maximumf %37, %38 : vector<8x256xf32>
    %c0_23 = arith.constant 0 : index
    %c0_24 = arith.constant 0 : index
    %c0_25 = arith.constant 0 : index
    %40 = vector.load %arg4[%c0_23, %c0_24, %c0_25] : memref<4x8x256xf32, #tpu.memory_space<vmem>>, vector<1x8x256xf32>
    %41 = vector.shape_cast %40 : vector<1x8x256xf32> to vector<8x256xf32>
    %42 = vector.shape_cast %39 : vector<8x256xf32> to vector<1x8x256xf32>
    tpu.vector_store %arg4[%c0_23, %c0_24, %c0_25], %42 {strides = array<i32>} : memref<4x8x256xf32, #tpu.memory_space<vmem>>, vector<1x8x256xf32>,
    %c1_26 = arith.constant 1 : index
    %c0_27 = arith.constant 0 : index
    %c0_28 = arith.constant 0 : index
    %43 = vector.load %arg1[%c1_26, %c0_27, %c0_28] : memref<4x8x256xf32, #tpu.memory_space<vmem>>, vector<1x8x256xf32>
    %44 = vector.shape_cast %43 : vector<1x8x256xf32> to vector<8x256xf32>
    %c1_i32_29 = arith.constant 1 : i32
    %45 = tpu.dynamic_rotate %44 by %c1_i32_29 dim 1 : vector<8x256xf32>, i32 -> vector<8x256xf32>
    %cst_30 = arith.constant 0.000000e+00 : f32
    %46 = vector.broadcast %cst_30 : f32 to vector<8x256xf32>
    %47 = arith.select %10, %46, %45 : vector<8x256xi1>, vector<8x256xf32>
    %c255_i32_31 = arith.constant 255 : i32
    %48 = tpu.dynamic_rotate %44 by %c255_i32_31 dim 1 : vector<8x256xf32>, i32 -> vector<8x256xf32>
    %cst_32 = arith.constant 0.000000e+00 : f32
    %49 = vector.broadcast %cst_32 : f32 to vector<8x256xf32>
    %50 = arith.select %12, %49, %48 : vector<8x256xi1>, vector<8x256xf32>
    %51 = tpu.concatenate %47, %44, %50 in 0 : vector<8x256xf32>, vector<8x256xf32>, vector<8x256xf32> -> vector<24x256xf32>
    %cst_33 = arith.constant dense<0.000000e+00> : vector<8x256xf32>
    %52 = tpu.matmul %1, %51, %cst_33 {dimension_numbers = #tpu.dot_dimension_numbers<[1], [0], [0], [1], [0, 0, 1, 1], [], []>} : vector<8x24xf32>, vector<24x256xf32>, vector<8x256xf32> -> vector<8x256xf32>
    %53 = vector.broadcast %5 : vector<8x1xf32> to vector<8x256xf32>
    %54 = arith.addf %52, %53 : vector<8x256xf32>
    %cst_34 = arith.constant 0.000000e+00 : f32
    %55 = vector.broadcast %cst_34 : f32 to vector<8x256xf32>
    %56 = arith.maximumf %54, %55 : vector<8x256xf32>
    %c1_i32_35 = arith.constant 1 : i32
    %57 = tpu.dynamic_rotate %56 by %c1_i32_35 dim 1 : vector<8x256xf32>, i32 -> vector<8x256xf32>
    %cst_36 = arith.constant 0.000000e+00 : f32
    %58 = vector.broadcast %cst_36 : f32 to vector<8x256xf32>
    %59 = arith.select %10, %58, %57 : vector<8x256xi1>, vector<8x256xf32>
    %c255_i32_37 = arith.constant 255 : i32
    %60 = tpu.dynamic_rotate %56 by %c255_i32_37 dim 1 : vector<8x256xf32>, i32 -> vector<8x256xf32>
    %cst_38 = arith.constant 0.000000e+00 : f32
    %61 = vector.broadcast %cst_38 : f32 to vector<8x256xf32>
    %62 = arith.select %12, %61, %60 : vector<8x256xi1>, vector<8x256xf32>
    %63 = tpu.concatenate %59, %56, %62 in 0 : vector<8x256xf32>, vector<8x256xf32>, vector<8x256xf32> -> vector<24x256xf32>
    %cst_39 = arith.constant dense<0.000000e+00> : vector<8x256xf32>
    %64 = tpu.matmul %3, %63, %cst_39 {dimension_numbers = #tpu.dot_dimension_numbers<[1], [0], [0], [1], [0, 0, 1, 1], [], []>} : vector<8x24xf32>, vector<24x256xf32>, vector<8x256xf32> -> vector<8x256xf32>
    %65 = vector.broadcast %7 : vector<8x1xf32> to vector<8x256xf32>
    %66 = arith.addf %64, %65 : vector<8x256xf32>
    %67 = arith.addf %66, %44 : vector<8x256xf32>
    %cst_40 = arith.constant 0.000000e+00 : f32
    %68 = vector.broadcast %cst_40 : f32 to vector<8x256xf32>
    %69 = arith.maximumf %67, %68 : vector<8x256xf32>
    %c1_41 = arith.constant 1 : index
    %c0_42 = arith.constant 0 : index
    %c0_43 = arith.constant 0 : index
    %70 = vector.load %arg4[%c1_41, %c0_42, %c0_43] : memref<4x8x256xf32, #tpu.memory_space<vmem>>, vector<1x8x256xf32>
    %71 = vector.shape_cast %70 : vector<1x8x256xf32> to vector<8x256xf32>
    %72 = vector.shape_cast %69 : vector<8x256xf32> to vector<1x8x256xf32>
    tpu.vector_store %arg4[%c1_41, %c0_42, %c0_43], %72 {strides = array<i32>} : memref<4x8x256xf32, #tpu.memory_space<vmem>>, vector<1x8x256xf32>,
    %c2 = arith.constant 2 : index
    %c0_44 = arith.constant 0 : index
    %c0_45 = arith.constant 0 : index
    %73 = vector.load %arg1[%c2, %c0_44, %c0_45] : memref<4x8x256xf32, #tpu.memory_space<vmem>>, vector<1x8x256xf32>
    %74 = vector.shape_cast %73 : vector<1x8x256xf32> to vector<8x256xf32>
    %c1_i32_46 = arith.constant 1 : i32
    %75 = tpu.dynamic_rotate %74 by %c1_i32_46 dim 1 : vector<8x256xf32>, i32 -> vector<8x256xf32>
    %cst_47 = arith.constant 0.000000e+00 : f32
    %76 = vector.broadcast %cst_47 : f32 to vector<8x256xf32>
    %77 = arith.select %10, %76, %75 : vector<8x256xi1>, vector<8x256xf32>
    %c255_i32_48 = arith.constant 255 : i32
    %78 = tpu.dynamic_rotate %74 by %c255_i32_48 dim 1 : vector<8x256xf32>, i32 -> vector<8x256xf32>
    %cst_49 = arith.constant 0.000000e+00 : f32
    %79 = vector.broadcast %cst_49 : f32 to vector<8x256xf32>
    %80 = arith.select %12, %79, %78 : vector<8x256xi1>, vector<8x256xf32>
    %81 = tpu.concatenate %77, %74, %80 in 0 : vector<8x256xf32>, vector<8x256xf32>, vector<8x256xf32> -> vector<24x256xf32>
    %cst_50 = arith.constant dense<0.000000e+00> : vector<8x256xf32>
    %82 = tpu.matmul %1, %81, %cst_50 {dimension_numbers = #tpu.dot_dimension_numbers<[1], [0], [0], [1], [0, 0, 1, 1], [], []>} : vector<8x24xf32>, vector<24x256xf32>, vector<8x256xf32> -> vector<8x256xf32>
    %83 = vector.broadcast %5 : vector<8x1xf32> to vector<8x256xf32>
    %84 = arith.addf %82, %83 : vector<8x256xf32>
    %cst_51 = arith.constant 0.000000e+00 : f32
    %85 = vector.broadcast %cst_51 : f32 to vector<8x256xf32>
    %86 = arith.maximumf %84, %85 : vector<8x256xf32>
    %c1_i32_52 = arith.constant 1 : i32
    %87 = tpu.dynamic_rotate %86 by %c1_i32_52 dim 1 : vector<8x256xf32>, i32 -> vector<8x256xf32>
    %cst_53 = arith.constant 0.000000e+00 : f32
    %88 = vector.broadcast %cst_53 : f32 to vector<8x256xf32>
    %89 = arith.select %10, %88, %87 : vector<8x256xi1>, vector<8x256xf32>
    %c255_i32_54 = arith.constant 255 : i32
    %90 = tpu.dynamic_rotate %86 by %c255_i32_54 dim 1 : vector<8x256xf32>, i32 -> vector<8x256xf32>
    %cst_55 = arith.constant 0.000000e+00 : f32
    %91 = vector.broadcast %cst_55 : f32 to vector<8x256xf32>
    %92 = arith.select %12, %91, %90 : vector<8x256xi1>, vector<8x256xf32>
    %93 = tpu.concatenate %89, %86, %92 in 0 : vector<8x256xf32>, vector<8x256xf32>, vector<8x256xf32> -> vector<24x256xf32>
    %cst_56 = arith.constant dense<0.000000e+00> : vector<8x256xf32>
    %94 = tpu.matmul %3, %93, %cst_56 {dimension_numbers = #tpu.dot_dimension_numbers<[1], [0], [0], [1], [0, 0, 1, 1], [], []>} : vector<8x24xf32>, vector<24x256xf32>, vector<8x256xf32> -> vector<8x256xf32>
    %95 = vector.broadcast %7 : vector<8x1xf32> to vector<8x256xf32>
    %96 = arith.addf %94, %95 : vector<8x256xf32>
    %97 = arith.addf %96, %74 : vector<8x256xf32>
    %cst_57 = arith.constant 0.000000e+00 : f32
    %98 = vector.broadcast %cst_57 : f32 to vector<8x256xf32>
    %99 = arith.maximumf %97, %98 : vector<8x256xf32>
    %c2_58 = arith.constant 2 : index
    %c0_59 = arith.constant 0 : index
    %c0_60 = arith.constant 0 : index
    %100 = vector.load %arg4[%c2_58, %c0_59, %c0_60] : memref<4x8x256xf32, #tpu.memory_space<vmem>>, vector<1x8x256xf32>
    %101 = vector.shape_cast %100 : vector<1x8x256xf32> to vector<8x256xf32>
    %102 = vector.shape_cast %99 : vector<8x256xf32> to vector<1x8x256xf32>
    tpu.vector_store %arg4[%c2_58, %c0_59, %c0_60], %102 {strides = array<i32>} : memref<4x8x256xf32, #tpu.memory_space<vmem>>, vector<1x8x256xf32>,
    %c3 = arith.constant 3 : index
    %c0_61 = arith.constant 0 : index
    %c0_62 = arith.constant 0 : index
    %103 = vector.load %arg1[%c3, %c0_61, %c0_62] : memref<4x8x256xf32, #tpu.memory_space<vmem>>, vector<1x8x256xf32>
    %104 = vector.shape_cast %103 : vector<1x8x256xf32> to vector<8x256xf32>
    %c1_i32_63 = arith.constant 1 : i32
    %105 = tpu.dynamic_rotate %104 by %c1_i32_63 dim 1 : vector<8x256xf32>, i32 -> vector<8x256xf32>
    %cst_64 = arith.constant 0.000000e+00 : f32
    %106 = vector.broadcast %cst_64 : f32 to vector<8x256xf32>
    %107 = arith.select %10, %106, %105 : vector<8x256xi1>, vector<8x256xf32>
    %c255_i32_65 = arith.constant 255 : i32
    %108 = tpu.dynamic_rotate %104 by %c255_i32_65 dim 1 : vector<8x256xf32>, i32 -> vector<8x256xf32>
    %cst_66 = arith.constant 0.000000e+00 : f32
    %109 = vector.broadcast %cst_66 : f32 to vector<8x256xf32>
    %110 = arith.select %12, %109, %108 : vector<8x256xi1>, vector<8x256xf32>
    %111 = tpu.concatenate %107, %104, %110 in 0 : vector<8x256xf32>, vector<8x256xf32>, vector<8x256xf32> -> vector<24x256xf32>
    %cst_67 = arith.constant dense<0.000000e+00> : vector<8x256xf32>
    %112 = tpu.matmul %1, %111, %cst_67 {dimension_numbers = #tpu.dot_dimension_numbers<[1], [0], [0], [1], [0, 0, 1, 1], [], []>} : vector<8x24xf32>, vector<24x256xf32>, vector<8x256xf32> -> vector<8x256xf32>
    %113 = vector.broadcast %5 : vector<8x1xf32> to vector<8x256xf32>
    %114 = arith.addf %112, %113 : vector<8x256xf32>
    %cst_68 = arith.constant 0.000000e+00 : f32
    %115 = vector.broadcast %cst_68 : f32 to vector<8x256xf32>
    %116 = arith.maximumf %114, %115 : vector<8x256xf32>
    %c1_i32_69 = arith.constant 1 : i32
    %117 = tpu.dynamic_rotate %116 by %c1_i32_69 dim 1 : vector<8x256xf32>, i32 -> vector<8x256xf32>
    %cst_70 = arith.constant 0.000000e+00 : f32
    %118 = vector.broadcast %cst_70 : f32 to vector<8x256xf32>
    %119 = arith.select %10, %118, %117 : vector<8x256xi1>, vector<8x256xf32>
    %c255_i32_71 = arith.constant 255 : i32
    %120 = tpu.dynamic_rotate %116 by %c255_i32_71 dim 1 : vector<8x256xf32>, i32 -> vector<8x256xf32>
    %cst_72 = arith.constant 0.000000e+00 : f32
    %121 = vector.broadcast %cst_72 : f32 to vector<8x256xf32>
    %122 = arith.select %12, %121, %120 : vector<8x256xi1>, vector<8x256xf32>
    %123 = tpu.concatenate %119, %116, %122 in 0 : vector<8x256xf32>, vector<8x256xf32>, vector<8x256xf32> -> vector<24x256xf32>
    %cst_73 = arith.constant dense<0.000000e+00> : vector<8x256xf32>
    %124 = tpu.matmul %3, %123, %cst_73 {dimension_numbers = #tpu.dot_dimension_numbers<[1], [0], [0], [1], [0, 0, 1, 1], [], []>} : vector<8x24xf32>, vector<24x256xf32>, vector<8x256xf32> -> vector<8x256xf32>
    %125 = vector.broadcast %7 : vector<8x1xf32> to vector<8x256xf32>
    %126 = arith.addf %124, %125 : vector<8x256xf32>
    %127 = arith.addf %126, %104 : vector<8x256xf32>
    %cst_74 = arith.constant 0.000000e+00 : f32
    %128 = vector.broadcast %cst_74 : f32 to vector<8x256xf32>
    %129 = arith.maximumf %127, %128 : vector<8x256xf32>
    %c3_75 = arith.constant 3 : index
    %c0_76 = arith.constant 0 : index
    %c0_77 = arith.constant 0 : index
    %130 = vector.load %arg4[%c3_75, %c0_76, %c0_77] : memref<4x8x256xf32, #tpu.memory_space<vmem>>, vector<1x8x256xf32>
    %131 = vector.shape_cast %130 : vector<1x8x256xf32> to vector<8x256xf32>
    %132 = vector.shape_cast %129 : vector<8x256xf32> to vector<1x8x256xf32>
    tpu.vector_store %arg4[%c3_75, %c0_76, %c0_77], %132 {strides = array<i32>} : memref<4x8x256xf32, #tpu.memory_space<vmem>>, vector<1x8x256xf32>,
    return
  }
  func.func @transform_0(%arg0: i32) -> (i32, i32, i32) {
    %c0_i32 = arith.constant 0 : i32
    %c0_i32_0 = arith.constant 0 : i32
    %c0_i32_1 = arith.constant 0 : i32
    return %arg0, %c0_i32, %c0_i32_0 : i32, i32, i32
  }
  func.func @transform_1(%arg0: i32) -> (i32, i32, i32) {
    %c0_i32 = arith.constant 0 : i32
    %c0_i32_0 = arith.constant 0 : i32
    %c0_i32_1 = arith.constant 0 : i32
    %c0_i32_2 = arith.constant 0 : i32
    return %c0_i32, %c0_i32_0, %c0_i32_1 : i32, i32, i32
  }
  func.func @transform_2(%arg0: i32) -> (i32, i32, i32) {
    %c0_i32 = arith.constant 0 : i32
    %c0_i32_0 = arith.constant 0 : i32
    %c0_i32_1 = arith.constant 0 : i32
    %c0_i32_2 = arith.constant 0 : i32
    return %c0_i32, %c0_i32_0, %c0_i32_1 : i32, i32, i32
  }
  func.func @transform_3(%arg0: i32) -> (i32, i32, i32) {
    %c0_i32 = arith.constant 0 : i32
    %c0_i32_0 = arith.constant 0 : i32
    %c0_i32_1 = arith.constant 0 : i32
    return %arg0, %c0_i32, %c0_i32_0 : i32, i32, i32
  }
}

</mosaic_0001>

<bundles_post_ra>
// kernel: tpu_custom_call.1
= control target key start
LH: loop header
LB: loop body
LE: loop exit
PB: predicated region body
PF: predicated region fallthrough
CT: control target
= control target key end

     0   :  { %8 = vsyncpa [#allocation3], 0  ;;  %s1180_s0 = inlined_call_operand.hbm [shape: f32[4,8,256], index: 0, kind: input, shape index: {}]   ;;  %s1181_s1 = inlined_call_operand.vmem [shape: f32[2,8,24], index: 1, kind: input, shape index: {}]   ;;  %s1182_s2 = inlined_call_operand.vmem [shape: f32[2,8,1], index: 2, kind: input, shape index: {}]   ;;  %s1183_s3 = inlined_call_operand.hbm [shape: f32[4,8,256], index: 3, kind: output, shape index: {}]  }
   0x1   :  { %9 = vsyncpa [#allocation4], 0  ;;  %s917_s12 = smov [#allocation2]  }
   0x2   :  { %s15_s13 = sshll.u32 %s917_s12, 4  ;;  %s16_s13 = int_to_ptr.vmem [resolvable:$true] %s15_s13 }
   0x3   :  { %s881_s14 = scalar_lea.vmem %s16_s13, 1024  ;;  %p886_p1 = scmp.lt.s32.totalorder %s16_s13, %s16_s13 }
   0x4   :  { %p882_p0 = scmp.ne.s32.totalorder %s16_s13, %s881_s14  ;;  %p887_p2 = scmp.lt.s32.totalorder %s881_s14, %s881_s14 }
   0x6   :  { %p888_p3 = por %p887_p2, %p886_p1 }
   0x8   :  { %p889_p4 = pnand %p888_p3, %p882_p0 }
   0xa   :  { %892 = shalt.err (!%p889_p4)
}
   0xb   :  { %s918_s15 = smov 256   ;;  %s919_s16 = smov 16  }
   0xc   :  { %21 = dma.hbm_to_vmem [thread:$0]  %s1180_s0, 1024, %s16_s13, [#allocation3], %s918_s15, %s918_s15, %s919_s16  }
   0xd   :  { %913 = dma.done.wait [#allocation3], 1024  }
   0xe   :  { %914 = vsyncadd [#allocation3], 4294966272  ;;  %v920_v0 = vmov 0.0   ;;  %v953_v1 = vld [vmem:[#allocation2] sm:$0xff]  ;;  %s921_s19 = smov 1   ;;  %s922_s20 = smov 127   ;;  %v35_v11 = vlaneseq }
   0xf   :  { %135 = vmatprep.mubr.f32.mxu0 %v920_v0  ;;  %232 = vmatprep.mubr.f32.mxu1 %v920_v0  ;;  %v959_v2 = vld [vmem:[#allocation2 + $0x8] sm:$0xff]  ;;  %v965_v3 = vld [vmem:[#allocation2 + $0x18] sm:$0xff]  ;;  %v967_v4 = vld [vmem:[#allocation2 + $0x10] sm:$0xff]  ;;  %v923_v7 = vmov 0   ;;  %vm67_vm4 = vcmask 195584  }
  0x10   :  { %44 = vrot.lane.b32.xlu1 %v953_v1, %s921_s19  ;;  %53 = vrot.lane.b32.xlu0 %v953_v1, %s922_s20  ;;  %v977_v5 = vld [vmem:[#allocation2 + $0x28] sm:$0xff]  ;;  %v979_v6 = vld [vmem:[#allocation2 + $0x20] sm:$0xff]  ;;  %v989_v8 = vld [vmem:[#allocation2 + $0x38] sm:$0xff]  ;;  %v1004_v12 = vand.u32 127, %v35_v11 }
  0x11   :  { %872 = vset.pattern.permute.xlu0 %v923_v7  ;;  %v991_v9 = vld [vmem:[#allocation2 + $0x30] sm:$0xff]  ;;  %v32_v10 = vld [vmem:[%s1182_s2] sm:$0xff] }
  0x12   :  { %v1007_v13 = vadd.s32 128, %v1004_v12  ;;  %vm57_vm0 = vcmp.lt.s32.totalorder %v1004_v12, 127  ;;  %vm48_vm2 = vcmp.lt.s32.totalorder %v1004_v12, 1  ;;  %vm863_vm3 = vcmp.ne.s32.totalorder %v1004_v12, 0  ;;  %v29_v24 = vld [vmem:[%s1181_s1] sm:$0xff] }
  0x14   :  { %46 = vrot.lane.b32.xlu1 %v959_v2, %s921_s19  ;;  %55 = vrot.lane.b32.xlu0 %v959_v2, %s922_s20  ;;  %vm862_vm1 = vcmp.ne.s32.totalorder %v1007_v13, 255 }
  0x18   :  { %258 = vrot.lane.b32.xlu1 %v965_v3, %s922_s20  ;;  %256 = vrot.lane.b32.xlu0 %v967_v4, %s922_s20 }
  0x1c   :  { %250 = vrot.lane.b32.xlu1 %v965_v3, %s921_s19  ;;  %248 = vrot.lane.b32.xlu0 %v967_v4, %s921_s19 }
  0x20   :  { %444 = vrot.lane.b32.xlu1 %v977_v5, %s922_s20  ;;  %442 = vrot.lane.b32.xlu0 %v979_v6, %s922_s20 }
  0x24   :  { %436 = vrot.lane.b32.xlu1 %v977_v5, %s921_s19  ;;  %434 = vrot.lane.b32.xlu0 %v979_v6, %s921_s19 }
  0x28   :  { %630 = vrot.lane.b32.xlu1 %v989_v8, %s922_s20  ;;  %628 = vrot.lane.b32.xlu0 %v991_v9, %s922_s20 }
  0x2c   :  { %622 = vrot.lane.b32.xlu1 %v989_v8, %s921_s19  ;;  %620 = vrot.lane.b32.xlu0 %v991_v9, %s921_s19 }
  0x30   :  { %64 = vperm.xlu0 %872, %v32_v10  }
  0x82   :  { %v45_v14 = vpop.permute.xlu1 %44  ;;  %v54_v15 = vpop.permute.xlu0 %53 }
  0x86   :  { %v47_v16 = vpop.permute.xlu1 %46  ;;  %v56_v17 = vpop.permute.xlu0 %55 }
  0x87   :  { %v59_v18 = vsel %vm57_vm0, %v56_v17, %v54_v15  ;;  %v58_v19 = vsel %vm57_vm0, %v54_v15, %v56_v17  ;;  %v49_v23 = vsel %vm48_vm2, %v45_v14, %v47_v16  ;;  %v50_v25 = vsel %vm48_vm2, %v47_v16, %v45_v14 }
  0x88   :  { %823 = vmatprep.subr.msk.mxu0 %vm862_vm1, %v59_v18 }
  0x89   :  { %98 = vmatpush1.msra.mxu0 %v58_v19  ;;  %v821_v19 = vld [vmem:[%s1182_s2 + $0x8] sm:$0xff] }
  0x8a   :  { %v259_v20 = vpop.permute.xlu1 %258  ;;  %99 = vmatprep.subr.mxu0 %v959_v2  ;;  %v257_v21 = vpop.permute.xlu0 %256 }
  0x8b   :  { %v261_v22 = vsel %vm57_vm0, %v259_v20, %v257_v21  ;;  %100 = vmatpush1.msra.mxu0 %v953_v1  ;;  %v260_v26 = vsel %vm57_vm0, %v257_v21, %v259_v20 }
  0x8c   :  { %101 = vmatprep.subr.mxu0 %v49_v23 }
  0x8d   :  { %825 = vmatpush1.msk.msra.mxu0 %vm863_vm3, %v50_v25 }
  0x8e   :  { %v251_v27 = vpop.permute.xlu1 %250  ;;  %833 = vmatprep.subr.msk.mxu0 %vm862_vm1, %v261_v22  ;;  %v249_v28 = vpop.permute.xlu0 %248  ;;  %826 = vmatmul.mubr.msk.f32.vlgmr.msra.gmra.mxu0 %vm67_vm4, %v29_v24 }
  0x8f   :  { %291 = vmatpush1.msra.mxu0 %v260_v26  ;;  %v252_v29 = vsel %vm48_vm2, %v249_v28, %v251_v27  ;;  %328 = vmatprep.mubr.f32.mxu0 %v920_v0  ;;  %v253_v30 = vsel %vm48_vm2, %v251_v27, %v249_v28 }
  0x90   :  { %292 = vmatprep.subr.mxu0 %v965_v3 }
  0x91   :  { %293 = vmatpush1.msra.mxu0 %v967_v4 }
  0x92   :  { %v445_v31 = vpop.permute.xlu1 %444  ;;  %v443_v32 = vpop.permute.xlu0 %442  ;;  %294 = vmatprep.subr.mxu0 %v252_v29  ;;  %v820_v29 = vld [vmem:[%s1181_s1 + $0x8] sm:$0xff]  ;;  %s924_s1 = smov [#allocation5]  }
  0x93   :  { %v446_v33 = vsel %vm57_vm0, %v443_v32, %v445_v31  ;;  %v447_v34 = vsel %vm57_vm0, %v445_v31, %v443_v32  ;;  %835 = vmatpush1.msk.msra.mxu0 %vm863_vm3, %v253_v30  ;;  %s808_s27 = sshll.u32 %s924_s1, 4  ;;  %s809_s27 = int_to_ptr.vmem [resolvable:$true] %s808_s27 }
  0x94   :  { %836 = vmatmul.mubr.msk.f32.vlgmr.msra.gmra.mxu0 %vm67_vm4, %v29_v24  ;;  %843 = vmatprep.subr.msk.mxu0 %vm862_vm1, %v447_v34  ;;  %s893_s28 = scalar_lea.vmem %s809_s27, 1024  ;;  %p898_p6 = scmp.lt.s32.totalorder %s809_s27, %s809_s27 }
  0x95   :  { %477 = vmatpush1.msra.mxu0 %v446_v33  ;;  %514 = vmatprep.mubr.f32.mxu0 %v920_v0  ;;  %p894_p5 = scmp.ne.s32.totalorder %s809_s27, %s893_s28  ;;  %p899_p7 = scmp.lt.s32.totalorder %s893_s28, %s893_s28 }
  0x96   :  { %v437_v35 = vpop.permute.xlu1 %436  ;;  %v435_v36 = vpop.permute.xlu0 %434  ;;  %478 = vmatprep.subr.mxu0 %v977_v5 }
  0x97   :  { %v439_v37 = vsel %vm48_vm2, %v437_v35, %v435_v36  ;;  %479 = vmatpush1.msra.mxu0 %v979_v6  ;;  %v438_v38 = vsel %vm48_vm2, %v435_v36, %v437_v35  ;;  %p900_p8 = por %p899_p7, %p898_p6 }
  0x98   :  { %480 = vmatprep.subr.mxu0 %v438_v38 }
  0x99   :  { %845 = vmatpush1.msk.msra.mxu0 %vm863_vm3, %v439_v37  ;;  %p901_p9 = pnand %p900_p8, %p894_p5 }
  0x9a   :  { %v631_v39 = vpop.permute.xlu1 %630  ;;  %v629_v40 = vpop.permute.xlu0 %628  ;;  %846 = vmatmul.mubr.msk.f32.vlgmr.msra.gmra.mxu0 %vm67_vm4, %v29_v24 }
  0x9b   :  { %v632_v41 = vsel %vm57_vm0, %v629_v40, %v631_v39  ;;  %v633_v42 = vsel %vm57_vm0, %v631_v39, %v629_v40  ;;  %700 = vmatprep.mubr.f32.mxu0 %v920_v0 }
  0x9c   :  { %853 = vmatprep.subr.msk.mxu0 %vm862_vm1, %v633_v42 }
  0x9d   :  { %663 = vmatpush1.msra.mxu0 %v632_v41 }
  0x9e   :  { %v623_v43 = vpop.permute.xlu1 %622  ;;  %v621_v44 = vpop.permute.xlu0 %620  ;;  %664 = vmatprep.subr.mxu0 %v989_v8 }
  0x9f   :  { %v625_v45 = vsel %vm48_vm2, %v623_v43, %v621_v44  ;;  %665 = vmatpush1.msra.mxu0 %v991_v9  ;;  %v624_v46 = vsel %vm48_vm2, %v621_v44, %v623_v43 }
  0xa0   :  { %666 = vmatprep.subr.mxu0 %v624_v46 }
  0xa1   :  { %855 = vmatpush1.msk.msra.mxu0 %vm863_vm3, %v625_v45 }
  0xa2   :  { %856 = vmatmul.mubr.msk.f32.vlgmr.msra.gmra.mxu0 %vm67_vm4, %v29_v24 }
  0xab   :  { %v65_v47 = vpop.permute.xlu0 %64 }
 0x14e   :  { %v137_v48 = vpop.f32.mrf.mxu0 }
 0x14f   :  { %v138_v49 = vadd.f32 %v137_v48, %v65_v47 }
 0x150   :  { %v139_v50 = vpop.f32.mrf.mxu0 }
 0x151   :  { %v142_v51 = vmax.f32 %v138_v49, 0.0  ;;  %v140_v52 = vadd.f32 %v139_v50, %v65_v47 }
 0x153   :  { %144 = vrot.lane.b32.xlu0 %v142_v51, %s921_s19  ;;  %152 = vrot.lane.b32.xlu1 %v142_v51, %s922_s20  ;;  %v143_v54 = vmax.f32 %v140_v52, 0.0 }
 0x154   :  { %v330_v53 = vpop.f32.mrf.mxu0 }
 0x155   :  { %v331_v55 = vadd.f32 %v330_v53, %v65_v47 }
 0x156   :  { %v332_v56 = vpop.f32.mrf.mxu0 }
 0x157   :  { %v335_v57 = vmax.f32 %v331_v55, 0.0  ;;  %154 = vrot.lane.b32.xlu1 %v143_v54, %s922_s20  ;;  %v333_v58 = vadd.f32 %v332_v56, %v65_v47 }
 0x159   :  { %345 = vrot.lane.b32.xlu0 %v335_v57, %s922_s20  ;;  %v336_v61 = vmax.f32 %v333_v58, 0.0 }
 0x15a   :  { %v516_v59 = vpop.f32.mrf.mxu0 }
 0x15b   :  { %v517_v60 = vadd.f32 %v516_v59, %v65_v47  ;;  %146 = vrot.lane.b32.xlu1 %v143_v54, %s921_s19 }
 0x15c   :  { %v518_v62 = vpop.f32.mrf.mxu0 }
 0x15d   :  { %337 = vrot.lane.b32.xlu0 %v335_v57, %s921_s19  ;;  %v1085_v63 = vmax.f32 %v517_v60, 0.0  ;;  %v519_v7 = vadd.f32 %v518_v62, %v65_v47 }
 0x15f   :  { %347 = vrot.lane.b32.xlu1 %v336_v61, %s922_s20  ;;  %v522_v14 = vmax.f32 %v519_v7, 0.0 }
 0x161   :  { %531 = vrot.lane.b32.xlu0 %v1085_v63, %s922_s20 }
 0x162   :  { %v702_v10 = vpop.f32.mrf.mxu0 }
 0x163   :  { %v703_v11 = vadd.f32 %v702_v10, %v65_v47  ;;  %339 = vrot.lane.b32.xlu1 %v336_v61, %s921_s19 }
 0x164   :  { %v704_v15 = vpop.f32.mrf.mxu0 }
 0x165   :  { %523 = vrot.lane.b32.xlu0 %v1085_v63, %s921_s19  ;;  %v1093_v16 = vmax.f32 %v703_v11, 0.0  ;;  %v705_v17 = vadd.f32 %v704_v15, %v65_v47 }
 0x167   :  { %533 = vrot.lane.b32.xlu1 %v522_v14, %s922_s20  ;;  %v708_v18 = vmax.f32 %v705_v17, 0.0 }
 0x169   :  { %717 = vrot.lane.b32.xlu0 %v1093_v16, %s922_s20 }
 0x16b   :  { %525 = vrot.lane.b32.xlu1 %v522_v14, %s921_s19 }
 0x16d   :  { %709 = vrot.lane.b32.xlu0 %v1093_v16, %s921_s19 }
 0x16f   :  { %719 = vrot.lane.b32.xlu1 %v708_v18, %s922_s20 }
 0x171   :  { %162 = vperm.xlu0 %872, %v821_v19  }
 0x173   :  { %711 = vrot.lane.b32.xlu1 %v708_v18, %s921_s19 }
 0x1c5   :  { %v153_v20 = vpop.permute.xlu1 %152  ;;  %v145_v21 = vpop.permute.xlu0 %144 }
 0x1c9   :  { %v155_v22 = vpop.permute.xlu1 %154 }
 0x1ca   :  { %v157_v23 = vsel %vm57_vm0, %v155_v22, %v153_v20  ;;  %v156_v24 = vsel %vm57_vm0, %v153_v20, %v155_v22 }
 0x1cb   :  { %v346_v25 = vpop.permute.xlu0 %345  ;;  %828 = vmatprep.subr.msk.mxu1 %vm862_vm1, %v157_v23 }
 0x1cc   :  { %195 = vmatpush1.msra.mxu1 %v156_v24 }
 0x1cd   :  { %196 = vmatprep.subr.mxu1 %v143_v54  ;;  %v147_v26 = vpop.permute.xlu1 %146 }
 0x1ce   :  { %v149_v27 = vsel %vm48_vm2, %v147_v26, %v145_v21  ;;  %197 = vmatpush1.msra.mxu1 %v142_v51  ;;  %v148_v28 = vsel %vm48_vm2, %v145_v21, %v147_v26 }
 0x1cf   :  { %v338_v30 = vpop.permute.xlu0 %337  ;;  %198 = vmatprep.subr.mxu1 %v148_v28 }
 0x1d0   :  { %830 = vmatpush1.msk.msra.mxu1 %vm863_vm3, %v149_v27 }
 0x1d1   :  { %831 = vmatmul.mubr.msk.f32.vlgmr.msra.gmra.mxu1 %vm67_vm4, %v820_v29  ;;  %v348_v31 = vpop.permute.xlu1 %347 }
 0x1d2   :  { %v349_v32 = vsel %vm57_vm0, %v346_v25, %v348_v31  ;;  %v350_v33 = vsel %vm57_vm0, %v348_v31, %v346_v25  ;;  %417 = vmatprep.mubr.f32.mxu1 %v920_v0 }
 0x1d3   :  { %v532_v34 = vpop.permute.xlu0 %531  ;;  %838 = vmatprep.subr.msk.mxu1 %vm862_vm1, %v350_v33 }
 0x1d4   :  { %380 = vmatpush1.msra.mxu1 %v349_v32 }
 0x1d5   :  { %381 = vmatprep.subr.mxu1 %v336_v61  ;;  %v340_v35 = vpop.permute.xlu1 %339 }
 0x1d6   :  { %v342_v36 = vsel %vm48_vm2, %v340_v35, %v338_v30  ;;  %382 = vmatpush1.msra.mxu1 %v335_v57  ;;  %v341_v37 = vsel %vm48_vm2, %v338_v30, %v340_v35 }
 0x1d7   :  { %383 = vmatprep.subr.mxu1 %v341_v37  ;;  %v524_v38 = vpop.permute.xlu0 %523 }
 0x1d8   :  { %840 = vmatpush1.msk.msra.mxu1 %vm863_vm3, %v342_v36 }
 0x1d9   :  { %841 = vmatmul.mubr.msk.f32.vlgmr.msra.gmra.mxu1 %vm67_vm4, %v820_v29  ;;  %v534_v39 = vpop.permute.xlu1 %533 }
 0x1da   :  { %v535_v40 = vsel %vm57_vm0, %v532_v34, %v534_v39  ;;  %v536_v41 = vsel %vm57_vm0, %v534_v39, %v532_v34  ;;  %603 = vmatprep.mubr.f32.mxu1 %v920_v0 }
 0x1db   :  { %848 = vmatprep.subr.msk.mxu1 %vm862_vm1, %v536_v41  ;;  %v718_v45 = vpop.permute.xlu0 %717 }
 0x1dc   :  { %566 = vmatpush1.msra.mxu1 %v535_v40 }
 0x1dd   :  { %567 = vmatprep.subr.mxu1 %v522_v14  ;;  %v526_v42 = vpop.permute.xlu1 %525 }
 0x1de   :  { %v528_v43 = vsel %vm48_vm2, %v526_v42, %v524_v38  ;;  %568 = vmatpush1.msra.mxu1 %v1085_v63  ;;  %v527_v44 = vsel %vm48_vm2, %v524_v38, %v526_v42 }
 0x1df   :  { %569 = vmatprep.subr.mxu1 %v527_v44  ;;  %v710_v49 = vpop.permute.xlu0 %709 }
 0x1e0   :  { %850 = vmatpush1.msk.msra.mxu1 %vm863_vm3, %v528_v43 }
 0x1e1   :  { %851 = vmatmul.mubr.msk.f32.vlgmr.msra.gmra.mxu1 %vm67_vm4, %v820_v29  ;;  %v720_v46 = vpop.permute.xlu1 %719 }
 0x1e2   :  { %v721_v47 = vsel %vm57_vm0, %v718_v45, %v720_v46  ;;  %v722_v48 = vsel %vm57_vm0, %v720_v46, %v718_v45  ;;  %789 = vmatprep.mubr.f32.mxu1 %v920_v0 }
 0x1e3   :  { %858 = vmatprep.subr.msk.mxu1 %vm862_vm1, %v722_v48 }
 0x1e4   :  { %752 = vmatpush1.msra.mxu1 %v721_v47 }
 0x1e5   :  { %753 = vmatprep.subr.mxu1 %v708_v18  ;;  %v712_v50 = vpop.permute.xlu1 %711 }
 0x1e6   :  { %v714_v51 = vsel %vm48_vm2, %v712_v50, %v710_v49  ;;  %754 = vmatpush1.msra.mxu1 %v1093_v16  ;;  %v713_v52 = vsel %vm48_vm2, %v710_v49, %v712_v50 }
 0x1e7   :  { %755 = vmatprep.subr.mxu1 %v713_v52 }
 0x1e8   :  { %860 = vmatpush1.msk.msra.mxu1 %vm863_vm3, %v714_v51 }
 0x1e9   :  { %861 = vmatmul.mubr.msk.f32.vlgmr.msra.gmra.mxu1 %vm67_vm4, %v820_v29 }
 0x1ec   :  { %v163_v0 = vpop.permute.xlu0 %162 }
 0x291   :  { %v234_v13 = vpop.f32.mrf.mxu1 }
 0x292   :  { %v235_v53 = vadd.f32 %v234_v13, %v163_v0 }
 0x293   :  { %v236_v54 = vpop.f32.mrf.mxu1 }
 0x294   :  { %v239_v55 = vadd.f32 %v235_v53, %v953_v1  ;;  %v237_v56 = vadd.f32 %v236_v54, %v163_v0 }
 0x296   :  { %v241_v57 = vmax.f32 %v239_v55, 0.0  ;;  %v240_v58 = vadd.f32 %v237_v56, %v959_v2 }
 0x298   :  { %243 = vst [vmem:[#allocation5] sm:$0xff] %v241_v57  ;;  %v242_v59 = vmax.f32 %v240_v58, 0.0 }
 0x299   :  { %v419_v60 = vpop.f32.mrf.mxu1 }
 0x29a   :  { %244 = vst [vmem:[#allocation5 + $0x8] sm:$0xff] %v242_v59  ;;  %v420_v61 = vadd.f32 %v419_v60, %v163_v0 }
 0x29b   :  { %v421_v62 = vpop.f32.mrf.mxu1 }
 0x29c   :  { %v424_v12 = vadd.f32 %v420_v61, %v967_v4  ;;  %v422_v63 = vadd.f32 %v421_v62, %v163_v0 }
 0x29e   :  { %v426_v7 = vmax.f32 %v424_v12, 0.0  ;;  %v425_v10 = vadd.f32 %v422_v63, %v965_v3 }
 0x2a0   :  { %429 = vst [vmem:[#allocation5 + $0x10] sm:$0xff] %v426_v7  ;;  %v427_v11 = vmax.f32 %v425_v10, 0.0 }
 0x2a1   :  { %v605_v14 = vpop.f32.mrf.mxu1 }
 0x2a2   :  { %430 = vst [vmem:[#allocation5 + $0x18] sm:$0xff] %v427_v11  ;;  %v606_v1 = vadd.f32 %v605_v14, %v163_v0 }
 0x2a3   :  { %v607_v15 = vpop.f32.mrf.mxu1 }
 0x2a4   :  { %v610_v2 = vadd.f32 %v606_v1, %v979_v6  ;;  %v608_v16 = vadd.f32 %v607_v15, %v163_v0 }
 0x2a6   :  { %v612_v17 = vmax.f32 %v610_v2, 0.0  ;;  %v611_v18 = vadd.f32 %v608_v16, %v977_v5 }
 0x2a8   :  { %615 = vst [vmem:[#allocation5 + $0x20] sm:$0xff] %v612_v17  ;;  %v613_v19 = vmax.f32 %v611_v18, 0.0 }
 0x2a9   :  { %v791_v20 = vpop.f32.mrf.mxu1 }
 0x2aa   :  { %616 = vst [vmem:[#allocation5 + $0x28] sm:$0xff] %v613_v19  ;;  %v792_v4 = vadd.f32 %v791_v20, %v163_v0 }
 0x2ab   :  { %v793_v21 = vpop.f32.mrf.mxu1 }
 0x2ac   :  { %v796_v3 = vadd.f32 %v792_v4, %v991_v9  ;;  %v794_v22 = vadd.f32 %v793_v21, %v163_v0 }
 0x2ae   :  { %v798_v23 = vmax.f32 %v796_v3, 0.0  ;;  %v797_v24 = vadd.f32 %v794_v22, %v989_v8 }
 0x2b0   :  { %801 = vst [vmem:[#allocation5 + $0x30] sm:$0xff] %v798_v23  ;;  %v799_v6 = vmax.f32 %v797_v24, 0.0 }
 0x2b2   :  { %802 = vst [vmem:[#allocation5 + $0x38] sm:$0xff] %v799_v6 }
 0x2b3   :  { %904 = shalt.err (!%p901_p9)
}
 0x2b4   :  { %814 = dma.vmem_to_hbm [thread:$0]  %s809_s27, 1024, %s1183_s3, [#allocation4], %s918_s15, %s918_s15, %s919_s16  }
 0x2b5   :  { %915 = dma.done.wait [#allocation4], 1024  }
 0x2b6   :  { %916 = vsyncadd [#allocation4], 4294966272 }
 0x2b7   :  { %818 = vsyncpa [#allocation3], 1 }
 0x2b8   :  { %819 = vsyncpa [#allocation4], 1 }

</bundles_post_ra>
